<compile_context>
chip_gen: v7x
topology: tpu7x:2x2x1
jax: 0.10.0
libtpu: 0.0.40
codegen_flags: <defaults>
</compile_context>

<pallas_src>
import math
import functools

import jax
import jax.numpy as jnp
from jax.experimental import pallas as pl
from jax.experimental.pallas import tpu as pltpu


def _pad_to(n, mult):
    return ((n + mult - 1) // mult) * mult


def _pick_tile(n, prefs):
    for p in prefs:
        if n % p == 0:
            return p
    return n


# ---------------------------------------------------------------------------
# Tiled linear:  (M, d_in) @ (d_in, N) + (N,)
# Grid = (row tiles, output-feature tiles, reduction tiles).  x row tiles, weight
# panels and bias chunks are streamed & double-buffered; f32 accumulator in VMEM.
# ---------------------------------------------------------------------------
def _linear_kernel(x_ref, w_ref, b_ref, o_ref, acc_ref):
    @pl.when(pl.program_id(2) == 0)
    def _():
        acc_ref[...] = jnp.zeros_like(acc_ref)

    acc_ref[...] += jnp.dot(x_ref[...], w_ref[...],
                            preferred_element_type=jnp.float32)

    @pl.when(pl.program_id(2) == pl.num_programs(2) - 1)
    def _():
        o_ref[...] = (acc_ref[...] + b_ref[...]).astype(o_ref.dtype)


def linear(x2, w, b, *, tm_pref=256):
    M, d_in = x2.shape
    N = w.shape[1]

    tm = min(tm_pref, _pad_to(M, 8))
    Mp = _pad_to(M, tm)
    tn = _pick_tile(N, (512, 256, 128))      # lane-dense output tile when possible
    tk = _pick_tile(d_in, (512, 256, 128))   # reduction tile

    xp = x2 if Mp == M else jnp.pad(x2, ((0, Mp - M), (0, 0)))
    b2 = b.reshape(1, N)

    grid = (Mp // tm, N // tn, d_in // tk)
    flops = 2 * Mp * d_in * N
    bytes_accessed = int((xp.size + w.size + b.size + Mp * N) * xp.dtype.itemsize)

    out = pl.pallas_call(
        _linear_kernel,
        out_shape=jax.ShapeDtypeStruct((Mp, N), x2.dtype),
        grid_spec=pltpu.PrefetchScalarGridSpec(
            num_scalar_prefetch=0,
            grid=grid,
            in_specs=[
                pl.BlockSpec((tm, tk), lambda i, j, k: (i, k)),   # x row/reduction tile
                pl.BlockSpec((tk, tn), lambda i, j, k: (k, j)),   # weight panel
                pl.BlockSpec((1, tn), lambda i, j, k: (0, j)),    # bias chunk
            ],
            out_specs=pl.BlockSpec((tm, tn), lambda i, j, k: (i, j)),
            scratch_shapes=[pltpu.VMEM((tm, tn), jnp.float32)],
        ),
        compiler_params=pltpu.CompilerParams(
            dimension_semantics=("parallel", "parallel", "arbitrary")),
        cost_estimate=pl.CostEstimate(
            flops=flops, transcendentals=0, bytes_accessed=bytes_accessed),
    )(xp, w, b2)
    return out[:M]


# ---------------------------------------------------------------------------
# Flash-attention style causal MHA kernel body (shared by both layouts).
# Blocks arrive as (1, t, hd); kv axis is the sequential reduction axis with
# VMEM m / l / acc scratch.  tq == tk == t, so the causal skip is just ki <= qi.
# ---------------------------------------------------------------------------
def _mha_kernel(q_ref, k_ref, v_ref, o_ref, m_sc, l_sc, acc_sc,
                *, t, scale, q_axis, kv_axis):
    qi = pl.program_id(q_axis)
    ki = pl.program_id(kv_axis)

    @pl.when(ki == 0)
    def _():
        m_sc[...] = jnp.full(m_sc.shape, -1e30, dtype=m_sc.dtype)
        l_sc[...] = jnp.zeros(l_sc.shape, dtype=l_sc.dtype)
        acc_sc[...] = jnp.zeros(acc_sc.shape, dtype=acc_sc.dtype)

    @pl.when(ki <= qi)          # kv tiles strictly above the causal diagonal are skipped
    def _():
        q = q_ref[0]            # (t, hd)
        k = k_ref[0]            # (t, hd)
        v = v_ref[0]            # (t, hd)

        s = jnp.dot(q, k.T, preferred_element_type=jnp.float32) * scale
        row = qi * t + jax.lax.broadcasted_iota(jnp.int32, (t, t), 0)
        col = ki * t + jax.lax.broadcasted_iota(jnp.int32, (t, t), 1)
        s = jnp.where(col <= row, s, -1e30)

        m_prev = m_sc[0]                                            # (t, 1)
        m_new = jnp.maximum(m_prev, s.max(axis=-1, keepdims=True))
        alpha = jnp.exp(m_prev - m_new)
        p = jnp.exp(s - m_new)
        l_sc[0] = alpha * l_sc[0] + p.sum(axis=-1, keepdims=True)
        acc_sc[0] = alpha * acc_sc[0] + jnp.dot(
            p.astype(v.dtype), v, preferred_element_type=jnp.float32)
        m_sc[0] = m_new

    @pl.when(ki == pl.num_programs(kv_axis) - 1)
    def _():
        o_ref[0] = (acc_sc[0] / l_sc[0]).astype(o_ref.dtype)


def _mha_scratch(t, hd):
    return [
        pltpu.VMEM((1, t, 1), jnp.float32),    # running max m
        pltpu.VMEM((1, t, 1), jnp.float32),    # running denom l
        pltpu.VMEM((1, t, hd), jnp.float32),   # output accumulator
    ]


# Fused-layout path: head blocks are sliced straight out of the combined QKV activation
# (B, L, 3*d_model) via index_map offsets, and outputs are written straight into the
# merged (B, L, d_model) layout.  Requires hd % 128 == 0 so blocks stay lane-aligned.
def causal_mha_fused_layout(qkv, *, h, d_model, scale, t_pref=128):
    B, L, _ = qkv.shape
    hd = d_model // h
    t = min(t_pref, _pad_to(L, 8))
    Lp = _pad_to(L, t)
    if Lp != L:
        # Padded key columns lie above the causal diagonal for every real query row,
        # so they are masked out; padded query rows are sliced off below.
        qkv = jnp.pad(qkv, ((0, 0), (0, Lp - L), (0, 0)))

    nq = Lp // t
    grid = (B, h, nq, nq)
    kernel = functools.partial(_mha_kernel, t=t, scale=scale, q_axis=2, kv_axis=3)

    q_spec = pl.BlockSpec((1, t, hd), lambda b, hh, qi, ki: (b, qi, hh))
    k_spec = pl.BlockSpec((1, t, hd), lambda b, hh, qi, ki, h=h: (b, ki, h + hh))
    v_spec = pl.BlockSpec((1, t, hd), lambda b, hh, qi, ki, h=h: (b, ki, 2 * h + hh))
    o_spec = pl.BlockSpec((1, t, hd), lambda b, hh, qi, ki: (b, qi, hh))

    out = pl.pallas_call(
        kernel,
        out_shape=jax.ShapeDtypeStruct((B, Lp, d_model), qkv.dtype),
        grid_spec=pltpu.PrefetchScalarGridSpec(
            num_scalar_prefetch=0,
            grid=grid,
            in_specs=[q_spec, k_spec, v_spec],
            out_specs=o_spec,
            scratch_shapes=_mha_scratch(t, hd),
        ),
        compiler_params=pltpu.CompilerParams(
            dimension_semantics=("parallel", "parallel", "parallel", "arbitrary")),
        cost_estimate=pl.CostEstimate(
            flops=int(4 * B * h * Lp * Lp * hd),
            transcendentals=int(B * h * Lp * Lp),
            bytes_accessed=int(4 * B * Lp * d_model * qkv.dtype.itemsize)),
    )(qkv, qkv, qkv)
    return out[:, :L, :]


# Fallback path for small / unaligned head dims: inputs already materialized as
# (B*h, L, hd), so block last dim equals the full array dim (layout-legal).
def causal_mha_split(qh, kh, vh, *, scale, t_pref=128):
    BH, L, hd = qh.shape
    t = min(t_pref, _pad_to(L, 8))
    Lp = _pad_to(L, t)
    if Lp != L:
        pad = ((0, 0), (0, Lp - L), (0, 0))
        qh, kh, vh = jnp.pad(qh, pad), jnp.pad(kh, pad), jnp.pad(vh, pad)

    nq = Lp // t
    grid = (BH, nq, nq)
    kernel = functools.partial(_mha_kernel, t=t, scale=scale, q_axis=1, kv_axis=2)

    out = pl.pallas_call(
        kernel,
        out_shape=jax.ShapeDtypeStruct((BH, Lp, hd), qh.dtype),
        grid_spec=pltpu.PrefetchScalarGridSpec(
            num_scalar_prefetch=0,
            grid=grid,
            in_specs=[
                pl.BlockSpec((1, t, hd), lambda b, qi, ki: (b, qi, 0)),
                pl.BlockSpec((1, t, hd), lambda b, qi, ki: (b, ki, 0)),
                pl.BlockSpec((1, t, hd), lambda b, qi, ki: (b, ki, 0)),
            ],
            out_specs=pl.BlockSpec((1, t, hd), lambda b, qi, ki: (b, qi, 0)),
            scratch_shapes=_mha_scratch(t, hd),
        ),
        compiler_params=pltpu.CompilerParams(
            dimension_semantics=("parallel", "parallel", "arbitrary")),
        cost_estimate=pl.CostEstimate(
            flops=int(4 * BH * Lp * Lp * hd),
            transcendentals=int(BH * Lp * Lp),
            bytes_accessed=int(4 * BH * Lp * hd * qh.dtype.itemsize)),
    )(qh, kh, vh)
    return out[:, :L, :]


# ---------------------------------------------------------------------------
# Full MultiHeadAttentionModule forward.
# Weights are stored (in_features, out_features) — i.e. transposed relative to
# torch.nn.Linear.weight — so the hot path is row-tile @ W on the MXU.
# ---------------------------------------------------------------------------
def multi_head_attention(x, w_qkv, b_qkv, w_proj, b_proj, *, h, attn_tile=128):
    B, L, d_model = x.shape
    assert d_model % h == 0
    hd = d_model // h
    M = B * L
    scale = 1.0 / math.sqrt(d_model)   # reference: d_k = K.size(-1) BEFORE head split

    # 1) combined QKV projection (nn.Linear(d_model, 3*d_model))
    qkv = linear(x.reshape(M, d_model), w_qkv, b_qkv)            # (M, 3*d_model)

    # 2) per-head causal attention
    if hd % 128 == 0:
        y2 = causal_mha_fused_layout(
            qkv.reshape(B, L, 3 * d_model), h=h, d_model=d_model,
            scale=scale, t_pref=attn_tile).reshape(M, d_model)
    else:
        q, k, v = jnp.split(qkv, 3, axis=-1)

        def to_heads(tns):
            return (tns.reshape(B, L, h, hd)
                       .transpose(0, 2, 1, 3)
                       .reshape(B * h, L, hd))

        yh = causal_mha_split(to_heads(q), to_heads(k), to_heads(v),
                              scale=scale, t_pref=attn_tile)      # (B*h, L, hd)
        y2 = (yh.reshape(B, h, L, hd)
                .transpose(0, 2, 1, 3)
                .reshape(M, d_model))

    # 3) output projection (dropout = identity in eval mode)
    out = linear(y2, w_proj, b_proj)                              # (M, d_model)
    return out.reshape(B, L, d_model)


# ---------------------------------------------------------------------------
# Pure-JAX reference (mirrors the PyTorch module in eval mode).
# ---------------------------------------------------------------------------
def _reference(x, w_qkv, b_qkv, w_proj, b_proj, h):
    B, L, d_model = x.shape
    hd = d_model // h
    hi = jax.lax.Precision.HIGHEST
    qkv = jnp.einsum("bld,de->ble", x, w_qkv, precision=hi) + b_qkv
    q, k, v = jnp.split(qkv, 3, axis=-1)

    def heads(t):
        return t.reshape(B, L, h, hd).transpose(0, 2, 1, 3)

    q, k, v = heads(q), heads(k), heads(v)
    scores = jnp.einsum("bhqd,bhkd->bhqk", q, k, precision=hi) / math.sqrt(d_model)
    mask = jnp.tril(jnp.ones((L, L), dtype=bool))
    scores = jnp.where(mask[None, None], scores, -jnp.inf)
    attn = jax.nn.softmax(scores, axis=-1)
    y = jnp.einsum("bhqk,bhkd->bhqd", attn, v, precision=hi)
    y = y.transpose(0, 2, 1, 3).reshape(B, L, d_model)
    return jnp.einsum("bld,de->ble", y, w_proj, precision=hi) + b_proj


def _make_params(key, d_model):
    kwq, kbq, kwp, kbp = jax.random.split(key, 4)
    lim = 1.0 / math.sqrt(d_model)   # nn.Linear-like uniform init; (in, out) layout
    w_qkv = jax.random.uniform(kwq, (d_model, 3 * d_model), jnp.float32, -lim, lim)
    b_qkv = jax.random.uniform(kbq, (3 * d_model,), jnp.float32, -lim, lim)
    w_proj = jax.random.uniform(kwp, (d_model, d_model), jnp.float32, -lim, lim)
    b_proj = jax.random.uniform(kbp, (d_model,), jnp.float32, -lim, lim)
    return w_qkv, b_qkv, w_proj, b_proj


def _check(B, L, d_model, h, key, attn_tile):
    kx, kp = jax.random.split(key)
    x = jax.random.normal(kx, (B, L, d_model), dtype=jnp.float32)
    w_qkv, b_qkv, w_proj, b_proj = _make_params(kp, d_model)

    out = multi_head_attention(x, w_qkv, b_qkv, w_proj, b_proj,
                               h=h, attn_tile=attn_tile)
    out = jax.block_until_ready(out)

    ref = _reference(x, w_qkv, b_qkv, w_proj, b_proj, h)
    assert out.shape == (B, L, d_model)
    assert jnp.allclose(out, ref, atol=2e-4, rtol=2e-4), (
        f"mismatch vs reference for (B={B}, L={L}, d_model={d_model}, h={h})")


if __name__ == "__main__":
    key = jax.random.PRNGKey(0)
    k1, k2 = jax.random.split(key)

    # Small config (head_dim = 8): exercises the materialized-heads fallback path.
    _check(B=2, L=8, d_model=32, h=4, key=k1, attn_tile=128)

    # Lane-aligned config (head_dim = 128): exercises the fused-layout flash path,
    # multiple q/kv tiles and sequence padding (L=40 with tile=16 -> 3 tiles).
    _check(B=2, L=40, d_model=256, h=2, key=k2, attn_tile=16)

    print("KERNEL_OK")
</pallas_src>

<mosaic_0001>
module attributes {stable_mosaic.version = 11 : i64} {
  func.func @_linear_kernel(%arg0: i32, %arg1: i32, %arg2: i32, %arg3: memref<16x32xf32, #tpu.memory_space<vmem>>, %arg4: memref<32x96xf32, #tpu.memory_space<vmem>>, %arg5: memref<1x96xf32, #tpu.memory_space<vmem>>, %arg6: memref<16x96xf32, #tpu.memory_space<vmem>>, %arg7: memref<16x96xf32, #tpu.memory_space<vmem>>) attributes {dimension_semantics = [#tpu.dimension_semantics<parallel>, #tpu.dimension_semantics<parallel>, #tpu.dimension_semantics<arbitrary>], iteration_bounds = array<i64: 1, 1, 1>, scalar_prefetch = 0 : i64, scratch_operands = 1 : i64, tpu.core_type = #tpu.core_type<tc>, window_params = [{transform_indices = @transform_0, window_bounds = array<i64: 16, 32>}, {transform_indices = @transform_1, window_bounds = array<i64: 32, 96>}, {transform_indices = @transform_2, window_bounds = array<i64: 1, 96>}, {transform_indices = @transform_3, window_bounds = array<i64: 16, 96>}]} {
    %c0_i32 = arith.constant 0 : i32
    %0 = arith.cmpi eq, %arg2, %c0_i32 : i32
    %1 = arith.extui %0 : i1 to i32
    %c0_i32_0 = arith.constant 0 : i32
    %2 = arith.cmpi ne, %1, %c0_i32_0 : i32
    scf.if %2 {
      %cst_10 = arith.constant 0.000000e+00 : f32
      %12 = vector.broadcast %cst_10 : f32 to vector<16x96xf32>
      %c0_11 = arith.constant 0 : index
      %c0_12 = arith.constant 0 : index
      %13 = vector.load %arg7[%c0_11, %c0_12] : memref<16x96xf32, #tpu.memory_space<vmem>>, vector<16x96xf32>
      tpu.vector_store %arg7[%c0_11, %c0_12], %12 {strides = array<i32>} : memref<16x96xf32, #tpu.memory_space<vmem>>, vector<16x96xf32>,
    } else {
    }
    %c0 = arith.constant 0 : index
    %c0_1 = arith.constant 0 : index
    %3 = vector.load %arg7[%c0, %c0_1] : memref<16x96xf32, #tpu.memory_space<vmem>>, vector<16x96xf32>
    %c0_2 = arith.constant 0 : index
    %c0_3 = arith.constant 0 : index
    %4 = vector.load %arg3[%c0_2, %c0_3] : memref<16x32xf32, #tpu.memory_space<vmem>>, vector<16x32xf32>
    %c0_4 = arith.constant 0 : index
    %c0_5 = arith.constant 0 : index
    %5 = vector.load %arg4[%c0_4, %c0_5] : memref<32x96xf32, #tpu.memory_space<vmem>>, vector<32x96xf32>
    %cst = arith.constant dense<0.000000e+00> : vector<16x96xf32>
    %6 = tpu.matmul %4, %5, %cst {dimension_numbers = #tpu.dot_dimension_numbers<[1], [0], [0], [1], [0, 0, 1, 1], [], []>} : vector<16x32xf32>, vector<32x96xf32>, vector<16x96xf32> -> vector<16x96xf32>
    %7 = arith.addf %3, %6 : vector<16x96xf32>
    %c0_6 = arith.constant 0 : index
    %c0_7 = arith.constant 0 : index
    %8 = vector.load %arg7[%c0_6, %c0_7] : memref<16x96xf32, #tpu.memory_space<vmem>>, vector<16x96xf32>
    tpu.vector_store %arg7[%c0_6, %c0_7], %7 {strides = array<i32>} : memref<16x96xf32, #tpu.memory_space<vmem>>, vector<16x96xf32>,
    %c0_i32_8 = arith.constant 0 : i32
    %9 = arith.cmpi eq, %arg2, %c0_i32_8 : i32
    %10 = arith.extui %9 : i1 to i32
    %c0_i32_9 = arith.constant 0 : i32
    %11 = arith.cmpi ne, %10, %c0_i32_9 : i32
    scf.if %11 {
      %c0_10 = arith.constant 0 : index
      %c0_11 = arith.constant 0 : index
      %12 = vector.load %arg7[%c0_10, %c0_11] : memref<16x96xf32, #tpu.memory_space<vmem>>, vector<16x96xf32>
      %c0_12 = arith.constant 0 : index
      %c0_13 = arith.constant 0 : index
      %13 = vector.load %arg5[%c0_12, %c0_13] : memref<1x96xf32, #tpu.memory_space<vmem>>, vector<1x96xf32>
      %14 = vector.broadcast %13 : vector<1x96xf32> to vector<16x96xf32>
      %15 = arith.addf %12, %14 : vector<16x96xf32>
      %c0_14 = arith.constant 0 : index
      %c0_15 = arith.constant 0 : index
      %16 = vector.load %arg6[%c0_14, %c0_15] : memref<16x96xf32, #tpu.memory_space<vmem>>, vector<16x96xf32>
      tpu.vector_store %arg6[%c0_14, %c0_15], %15 {strides = array<i32>} : memref<16x96xf32, #tpu.memory_space<vmem>>, vector<16x96xf32>,
    } else {
    }
    return
  }
  func.func @transform_0(%arg0: i32, %arg1: i32, %arg2: i32) -> (i32, i32) {
    %c0_i32 = arith.constant 0 : i32
    return %arg0, %arg2 : i32, i32
  }
  func.func @transform_1(%arg0: i32, %arg1: i32, %arg2: i32) -> (i32, i32) {
    %c0_i32 = arith.constant 0 : i32
    return %arg2, %arg1 : i32, i32
  }
  func.func @transform_2(%arg0: i32, %arg1: i32, %arg2: i32) -> (i32, i32) {
    %c0_i32 = arith.constant 0 : i32
    %c0_i32_0 = arith.constant 0 : i32
    return %c0_i32, %arg1 : i32, i32
  }
  func.func @transform_3(%arg0: i32, %arg1: i32, %arg2: i32) -> (i32, i32) {
    %c0_i32 = arith.constant 0 : i32
    return %arg0, %arg1 : i32, i32
  }
}

</mosaic_0001>

<bundles_post_ra>
// kernel: tpu_custom_call.1
= control target key start
LH: loop header
LB: loop body
LE: loop exit
PB: predicated region body
PF: predicated region fallthrough
CT: control target
= control target key end

     0   :  { %8 = vsyncpa [#allocation4], 0  ;;  %s365_s0 = inlined_call_operand.hbm [shape: f32[16,32], index: 0, kind: input, shape index: {}]   ;;  %s366_s1 = inlined_call_operand.hbm [shape: f32[32,96], index: 1, kind: input, shape index: {}]   ;;  %s367_s2 = inlined_call_operand.vmem [shape: f32[1,96], index: 2, kind: input, shape index: {}]   ;;  %s368_s3 = inlined_call_operand.hbm [shape: f32[16,96], index: 3, kind: output, shape index: {}]  }
   0x1   :  { %9 = vsyncpa [#allocation7], 0 }
   0x2   :  { %10 = vsyncpa [#allocation5], 0  ;;  %s285_s12 = smov [#allocation3]   ;;  %s213_s16 = scalar_lea.hbm %s365_s0, 256 }
   0x3   :  { %s16_s13 = sshll.u32 %s285_s12, 4  ;;  %p214_p0 = scmp.ne.s32.totalorder %s365_s0, %s213_s16  ;;  %s17_s13 = int_to_ptr.vmem [resolvable:$true] %s16_s13 }
   0x4   :  { %p217_p1 = scmp.lt.u32.totalorder %s213_s16, %s365_s0 }
   0x6   :  { %p219_p2 = pnand %p217_p1, %p214_p0 }
   0x8   :  { %222 = shalt.err (!%p219_p2)
}
   0x9   :  { %s223_s21 = scalar_lea.vmem %s17_s13, 256  ;;  %p228_p4 = scmp.lt.s32.totalorder %s17_s13, %s17_s13 }
   0xa   :  { %p224_p3 = scmp.ne.s32.totalorder %s17_s13, %s223_s21  ;;  %p229_p5 = scmp.lt.s32.totalorder %s223_s21, %s223_s21 }
   0xc   :  { %p230_p6 = por %p229_p5, %p228_p4 }
   0xe   :  { %p231_p7 = pnand %p230_p6, %p224_p3 }
  0x10   :  { %234 = shalt.err (!%p231_p7)
}
  0x11   :  { %s286_s22 = smov 128   ;;  %s287_s23 = smov 8  }
  0x12   :  { %22 = dma.hbm_to_vmem [thread:$0]  %s365_s0, 256, %s17_s13, [#allocation4], %s286_s22, %s286_s22, %s287_s23  }
  0x13   :  { %s288_s26 = smov [#allocation6]   ;;  %s235_s30 = scalar_lea.hbm %s366_s1, 512 }
  0x14   :  { %s28_s27 = sshll.u32 %s288_s26, 4  ;;  %p236_p8 = scmp.ne.s32.totalorder %s366_s1, %s235_s30  ;;  %s29_s27 = int_to_ptr.vmem [resolvable:$true] %s28_s27 }
  0x15   :  { %p239_p9 = scmp.lt.u32.totalorder %s235_s30, %s366_s1 }
  0x17   :  { %p241_p10 = pnand %p239_p9, %p236_p8 }
  0x19   :  { %244 = shalt.err (!%p241_p10)
}
  0x1a   :  { %s245_s8 = scalar_lea.vmem %s29_s27, 512  ;;  %p250_p12 = scmp.lt.s32.totalorder %s29_s27, %s29_s27 }
  0x1b   :  { %p246_p11 = scmp.ne.s32.totalorder %s29_s27, %s245_s8  ;;  %p251_p13 = scmp.lt.s32.totalorder %s245_s8, %s245_s8 }
  0x1d   :  { %p252_p0 = por %p251_p13, %p250_p12 }
  0x1f   :  { %p253_p1 = pnand %p252_p0, %p246_p11 }
  0x21   :  { %256 = shalt.err (!%p253_p1)
}
  0x22   :  { %34 = dma.hbm_to_vmem [thread:$0]  %s366_s1, 512, %s29_s27, [#allocation7], %s286_s22, %s286_s22, %s287_s23  }
  0x23   :  { %279 = dma.done.wait [#allocation4], 256  }
  0x24   :  { %280 = vsyncadd [#allocation4], 4294967040 }
  0x25   :  { %281 = dma.done.wait [#allocation7], 512  }
  0x26   :  { %282 = vsyncadd [#allocation7], 4294966784  ;;  %vm47_vm0 = vcmask 785408   ;;  %v289_v0 = vmov 0.0   ;;  %vm58_vm1 = vcmask 261120   ;;  %v54_v1 = vld [vmem:[#allocation6] sm:$0xff] }
  0x27   :  { %49 = vst.msk [vmem:[#allocation2 + $0x8] sm:$0xff] %vm47_vm0, %v289_v0  ;;  %48 = vst.msk [vmem:[#allocation2] sm:$0xff] %vm47_vm0, %v289_v0  ;;  %v55_v2 = vld [vmem:[#allocation6 + $0x8] sm:$0xff]  ;;  %v56_v3 = vld [vmem:[#allocation6 + $0x10] sm:$0xff]  ;;  %s290_s11 = smov [#allocation8]  }
  0x28   :  { %v199_v4 = vpack.c.bf16 %v55_v2, %v54_v1  ;;  %v57_v5 = vld [vmem:[#allocation6 + $0x18] sm:$0xff]  ;;  %v52_v6 = vld [vmem:[#allocation3] sm:$0xff]  ;;  %v181_v15 = vld [vmem:[%s367_s2] ss:$0 sm:$0xff]  ;;  %s166_s12 = sshll.u32 %s290_s11, 4  ;;  %s167_s12 = int_to_ptr.vmem [resolvable:$true] %s166_s12 }
  0x29   :  { %v203_v7 = vpack.c.bf16 %v57_v5, %v56_v3  ;;  %196 = vmatprep.mubr.msk.f32.mxu0 %vm58_vm1, %v52_v6  ;;  %v53_v8 = vld [vmem:[#allocation3 + $0x8] sm:$0xff]  ;;  %s257_s13 = scalar_lea.vmem %s167_s12, 256  ;;  %p262_p3 = scmp.lt.s32.totalorder %s167_s12, %s167_s12 }
  0x2a   :  { %200 = vmatprep.subr.bf16.mxu0 %v199_v4  ;;  %p258_p2 = scmp.ne.s32.totalorder %s167_s12, %s257_s13  ;;  %p263_p4 = scmp.lt.s32.totalorder %s257_s13, %s257_s13 }
  0x2b   :  { %202 = vmatpush3.bf16.msra.mxu0 %v199_v4 }
  0x2c   :  { %204 = vmatprep.subr.bf16.mxu0 %v203_v7  ;;  %p264_p5 = por %p263_p4, %p262_p3 }
  0x2e   :  { %v51_v9 = vld [vmem:[#allocation2 + $0x8] sm:$0xff]  ;;  %v50_v10 = vld [vmem:[#allocation2] sm:$0xff]  ;;  %p265_p6 = pnand %p264_p5, %p258_p2 }
  0x2f   :  { %206 = vmatpush3.bf16.msra.mxu0 %v203_v7 }
  0x32   :  { %197 = vmatmul.mubr.msk.f32.vlgmr.msra.gmra.mrb[0].mxu0 %vm58_vm1, %v53_v8 }
 0x105   :  { %v198_v11 = vpop.f32.mrb[0].mxu0 }
 0x106   :  { %v141_v12 = vadd.f32 %v198_v11, %v51_v9  ;;  %v131_v13 = vpop.f32.mrb[1].mxu0 }
 0x107   :  { %v140_v14 = vadd.f32 %v131_v13, %v50_v10 }
 0x108   :  { %144 = vst.msk [vmem:[#allocation2 + $0x8] sm:$0xff] %vm47_vm0, %v141_v12 }
 0x109   :  { %143 = vst.msk [vmem:[#allocation2] sm:$0xff] %vm47_vm0, %v140_v14 }
 0x10f   :  { %v149_v16 = vld [vmem:[#allocation2 + $0x8] sm:$0xff] }
 0x110   :  { %v148_v17 = vld [vmem:[#allocation2] sm:$0xff]  ;;  %v158_v18 = vadd.f32 %v181_v15, %v149_v16 }
 0x111   :  { %v157_v19 = vadd.f32 %v181_v15, %v148_v17 }
 0x112   :  { %160 = vst.msk [vmem:[#allocation8 + $0x8] sm:$0xff] %vm47_vm0, %v158_v18 }
 0x113   :  { %159 = vst.msk [vmem:[#allocation8] sm:$0xff] %vm47_vm0, %v157_v19 }
 0x114   :  { %268 = shalt.err (!%p265_p6)
}
 0x115   :  { %s269_s15 = scalar_lea.hbm %s368_s3, 256 }
 0x116   :  { %p270_p7 = scmp.ne.s32.totalorder %s368_s3, %s269_s15  ;;  %p273_p8 = scmp.lt.u32.totalorder %s269_s15, %s368_s3 }
 0x118   :  { %p275_p9 = pnand %p273_p8, %p270_p7 }
 0x11a   :  { %278 = shalt.err (!%p275_p9)
}
 0x11b   :  { %172 = dma.vmem_to_hbm [thread:$0]  %s167_s12, 256, %s368_s3, [#allocation5], %s286_s22, %s286_s22, %s287_s23  }
 0x11c   :  { %283 = dma.done.wait [#allocation5], 256  }
 0x11d   :  { %284 = vsyncadd [#allocation5], 4294967040 }
 0x11e   :  { %176 = vsyncpa [#allocation4], 1 }
 0x11f   :  { %177 = vsyncpa [#allocation7], 1 }
 0x120   :  { %178 = vsyncpa [#allocation5], 1 }

</bundles_post_ra>
